<compile_context>
chip_gen: v7x
topology: tpu7x:2x2x1
jax: 0.10.0
libtpu: 0.0.40
codegen_flags: <defaults>
</compile_context>

<pallas_src>
import functools

import jax
import jax.numpy as jnp
from jax.experimental import pallas as pl
from jax.experimental.pallas import tpu as pltpu

_EPS = 1e-12
_MARGIN = 0.0

# Keep 2 inputs x 2 pipeline buffers under ~12 MiB so double-buffering survives
# the smallest default scoped-VMEM limit (v5e: 16 MiB) without compiler params.
_VMEM_INPUT_BUDGET_BYTES = 12 * 1024 * 1024
_MAX_TB = 1024


def _round_up(x: int, m: int) -> int:
    return ((x + m - 1) // m) * m


def _cosine_embedding_loss_kernel(x_ref, y_ref, lbl_ref, out_ref):
    # x_ref, y_ref: (TB, D) ; lbl_ref: (TB, 1) f32 ; out_ref: (TB, 1) f32
    x = x_ref[...].astype(jnp.float32)
    y = y_ref[...].astype(jnp.float32)
    target = lbl_ref[...] * 2.0 - 1.0                     # {0,1} -> {-1,+1}

    prod = jnp.sum(x * y, axis=-1, keepdims=True)         # (TB, 1)
    mag1 = jnp.sum(x * x, axis=-1, keepdims=True) + _EPS  # (TB, 1)
    mag2 = jnp.sum(y * y, axis=-1, keepdims=True) + _EPS  # (TB, 1)
    cos = prod * jax.lax.rsqrt(mag1 * mag2)               # rsqrt -> EUP slot

    # labels are exactly {0,1}, so target is exactly +/-1: one fused select.
    out_ref[...] = jnp.where(target > 0.0,
                             1.0 - cos,
                             jnp.maximum(cos - _MARGIN, 0.0))


@functools.partial(jax.jit, static_argnames=("block_b",))
def contrastive_loss(resume_emb, jd_emb, labels, block_b=None):
    """resume_emb, jd_emb: (B, D); labels: (B,) in {0,1}. Returns scalar f32."""
    B, D = resume_emb.shape
    itemsize = jnp.dtype(resume_emb.dtype).itemsize

    # Lane-dense padding of the feature dim (zeros do not change dot / norms).
    D_pad = _round_up(D, 128)

    # Batch tile: multiple of 8, sized against the double-buffered VMEM budget.
    if block_b is None:
        bytes_per_row = 2 * 2 * D_pad * itemsize          # 2 inputs x 2 buffers
        tb = max(8, min(_MAX_TB, (_VMEM_INPUT_BUDGET_BYTES // bytes_per_row) // 8 * 8))
    else:
        tb = _round_up(block_b, 8)
    tb = min(tb, _round_up(B, 8))
    B_pad = _round_up(B, tb)
    num_blocks = B_pad // tb

    # Zero-pad batch + feature dims; pad labels with 0 -> padded rows give loss 0.
    xp = jnp.pad(resume_emb, ((0, B_pad - B), (0, D_pad - D)))
    yp = jnp.pad(jd_emb, ((0, B_pad - B), (0, D_pad - D)))
    lbl = jnp.pad(labels.astype(jnp.float32), (0, B_pad - B)).reshape(B_pad, 1)

    per_sample = pl.pallas_call(
        _cosine_embedding_loss_kernel,
        out_shape=jax.ShapeDtypeStruct((B_pad, 1), jnp.float32),
        grid=(num_blocks,),
        in_specs=[
            pl.BlockSpec((tb, D_pad), lambda i: (i, 0)),
            pl.BlockSpec((tb, D_pad), lambda i: (i, 0)),
            pl.BlockSpec((tb, 1), lambda i: (i, 0)),
        ],
        out_specs=pl.BlockSpec((tb, 1), lambda i: (i, 0)),
        compiler_params=pltpu.CompilerParams(
            dimension_semantics=("parallel",),            # shard across TCs (v7x)
        ),
        cost_estimate=pl.CostEstimate(
            flops=6 * B_pad * D_pad,
            transcendentals=B_pad,
            bytes_accessed=2 * B_pad * D_pad * itemsize + 2 * B_pad * 4,
        ),
    )(xp, yp, lbl)

    # reduction='mean' over the TRUE batch size (padded rows contribute 0).
    return jnp.sum(per_sample) / B


def _reference_loss(resume_emb, jd_emb, labels):
    # Plain-JAX reference mirroring torch's cosine_embedding_loss for validation.
    x = resume_emb.astype(jnp.float32)
    y = jd_emb.astype(jnp.float32)
    target = labels.astype(jnp.float32) * 2.0 - 1.0
    prod = jnp.sum(x * y, axis=-1)
    mag1 = jnp.sum(x * x, axis=-1) + _EPS
    mag2 = jnp.sum(y * y, axis=-1) + _EPS
    cos = prod / jnp.sqrt(mag1 * mag2)
    per = jnp.where(target == 1.0, 1.0 - cos, 0.0) + \
          jnp.where(target == -1.0, jnp.maximum(cos - _MARGIN, 0.0), 0.0)
    return jnp.mean(per)


if __name__ == "__main__":
    key = jax.random.PRNGKey(0)

    # Case 1: aligned small shape (B=8, D=128).
    k1, k2, k3, k4, k5, k6 = jax.random.split(key, 6)
    B, D = 8, 128
    resume_emb = jax.random.normal(k1, (B, D), dtype=jnp.float32)
    jd_emb = jax.random.normal(k2, (B, D), dtype=jnp.float32)
    labels = jax.random.bernoulli(k3, p=0.5, shape=(B,)).astype(jnp.int32)

    loss = contrastive_loss(resume_emb, jd_emb, labels)
    jax.block_until_ready(loss)
    ref = _reference_loss(resume_emb, jd_emb, labels)
    assert jnp.allclose(loss, ref, atol=1e-5, rtol=1e-5), (loss, ref)

    # Case 2: unaligned shape (exercises batch/feature padding path).
    B2, D2 = 6, 200
    r2 = jax.random.normal(k4, (B2, D2), dtype=jnp.float32)
    j2 = jax.random.normal(k5, (B2, D2), dtype=jnp.float32)
    l2 = jax.random.bernoulli(k6, p=0.5, shape=(B2,)).astype(jnp.int32)

    loss2 = contrastive_loss(r2, j2, l2)
    jax.block_until_ready(loss2)
    ref2 = _reference_loss(r2, j2, l2)
    assert jnp.allclose(loss2, ref2, atol=1e-5, rtol=1e-5), (loss2, ref2)

    print("KERNEL_OK")
</pallas_src>

<mosaic_0001>
module attributes {stable_mosaic.version = 11 : i64} {
  func.func @_cosine_embedding_loss_kernel(%arg0: i32, %arg1: memref<8x128xf32, #tpu.memory_space<vmem>>, %arg2: memref<8x128xf32, #tpu.memory_space<vmem>>, %arg3: memref<8x1xf32, #tpu.memory_space<vmem>>, %arg4: memref<8x1xf32, #tpu.memory_space<vmem>>) attributes {dimension_semantics = [#tpu.dimension_semantics<parallel>], iteration_bounds = array<i64: 1>, scalar_prefetch = 0 : i64, scratch_operands = 0 : i64, tpu.core_type = #tpu.core_type<tc>, window_params = [{transform_indices = @transform_0, window_bounds = array<i64: 8, 128>}, {transform_indices = @transform_1, window_bounds = array<i64: 8, 128>}, {transform_indices = @transform_2, window_bounds = array<i64: 8, 1>}, {transform_indices = @transform_3, window_bounds = array<i64: 8, 1>}]} {
    %c0 = arith.constant 0 : index
    %c0_0 = arith.constant 0 : index
    %0 = vector.load %arg1[%c0, %c0_0] : memref<8x128xf32, #tpu.memory_space<vmem>>, vector<8x128xf32>
    %c0_1 = arith.constant 0 : index
    %c0_2 = arith.constant 0 : index
    %1 = vector.load %arg2[%c0_1, %c0_2] : memref<8x128xf32, #tpu.memory_space<vmem>>, vector<8x128xf32>
    %c0_3 = arith.constant 0 : index
    %c0_4 = arith.constant 0 : index
    %2 = vector.load %arg3[%c0_3, %c0_4] : memref<8x1xf32, #tpu.memory_space<vmem>>, vector<8x1xf32>
    %cst = arith.constant 2.000000e+00 : f32
    %3 = vector.broadcast %cst : f32 to vector<8x1xf32>
    %4 = arith.mulf %2, %3 : vector<8x1xf32>
    %cst_5 = arith.constant 1.000000e+00 : f32
    %5 = vector.broadcast %cst_5 : f32 to vector<8x1xf32>
    %6 = arith.subf %4, %5 : vector<8x1xf32>
    %7 = arith.mulf %0, %1 : vector<8x128xf32>
    %cst_6 = arith.constant dense<0.000000e+00> : vector<8xf32>
    %8 = vector.multi_reduction <add>, %7, %cst_6 [1] : vector<8x128xf32> to vector<8xf32>
    %9 = vector.shape_cast %8 : vector<8xf32> to vector<8x1xf32>
    %10 = arith.mulf %0, %0 : vector<8x128xf32>
    %cst_7 = arith.constant dense<0.000000e+00> : vector<8xf32>
    %11 = vector.multi_reduction <add>, %10, %cst_7 [1] : vector<8x128xf32> to vector<8xf32>
    %12 = vector.shape_cast %11 : vector<8xf32> to vector<8x1xf32>
    %cst_8 = arith.constant 9.99999996E-13 : f32
    %13 = vector.broadcast %cst_8 : f32 to vector<8x1xf32>
    %14 = arith.addf %12, %13 : vector<8x1xf32>
    %15 = arith.mulf %1, %1 : vector<8x128xf32>
    %cst_9 = arith.constant dense<0.000000e+00> : vector<8xf32>
    %16 = vector.multi_reduction <add>, %15, %cst_9 [1] : vector<8x128xf32> to vector<8xf32>
    %17 = vector.shape_cast %16 : vector<8xf32> to vector<8x1xf32>
    %cst_10 = arith.constant 9.99999996E-13 : f32
    %18 = vector.broadcast %cst_10 : f32 to vector<8x1xf32>
    %19 = arith.addf %17, %18 : vector<8x1xf32>
    %20 = arith.mulf %14, %19 : vector<8x1xf32>
    %21 = math.rsqrt %20 : vector<8x1xf32>
    %22 = arith.mulf %9, %21 : vector<8x1xf32>
    %cst_11 = arith.constant 0.000000e+00 : f32
    %23 = vector.broadcast %cst_11 : f32 to vector<8x1xf32>
    %24 = arith.cmpf ogt, %6, %23 : vector<8x1xf32>
    %cst_12 = arith.constant 1.000000e+00 : f32
    %25 = vector.broadcast %cst_12 : f32 to vector<8x1xf32>
    %26 = arith.subf %25, %22 : vector<8x1xf32>
    %cst_13 = arith.constant 0.000000e+00 : f32
    %27 = vector.broadcast %cst_13 : f32 to vector<8x1xf32>
    %28 = arith.subf %22, %27 : vector<8x1xf32>
    %cst_14 = arith.constant 0.000000e+00 : f32
    %29 = vector.broadcast %cst_14 : f32 to vector<8x1xf32>
    %30 = arith.maximumf %28, %29 : vector<8x1xf32>
    %31 = arith.select %24, %26, %30 : vector<8x1xi1>, vector<8x1xf32>
    %c0_15 = arith.constant 0 : index
    %c0_16 = arith.constant 0 : index
    %32 = vector.load %arg4[%c0_15, %c0_16] : memref<8x1xf32, #tpu.memory_space<vmem>>, vector<8x1xf32>
    tpu.vector_store %arg4[%c0_15, %c0_16], %31 {strides = array<i32>} : memref<8x1xf32, #tpu.memory_space<vmem>>, vector<8x1xf32>,
    return
  }
  func.func @transform_0(%arg0: i32) -> (i32, i32) {
    %c0_i32 = arith.constant 0 : i32
    %c0_i32_0 = arith.constant 0 : i32
    return %arg0, %c0_i32 : i32, i32
  }
  func.func @transform_1(%arg0: i32) -> (i32, i32) {
    %c0_i32 = arith.constant 0 : i32
    %c0_i32_0 = arith.constant 0 : i32
    return %arg0, %c0_i32 : i32, i32
  }
  func.func @transform_2(%arg0: i32) -> (i32, i32) {
    %c0_i32 = arith.constant 0 : i32
    %c0_i32_0 = arith.constant 0 : i32
    return %arg0, %c0_i32 : i32, i32
  }
  func.func @transform_3(%arg0: i32) -> (i32, i32) {
    %c0_i32 = arith.constant 0 : i32
    %c0_i32_0 = arith.constant 0 : i32
    return %arg0, %c0_i32 : i32, i32
  }
}

</mosaic_0001>

<bundles_post_ra>
// kernel: contrastive_loss.1
= control target key start
LH: loop header
LB: loop body
LE: loop exit
PB: predicated region body
PF: predicated region fallthrough
CT: control target
= control target key end

     0   :  { %vm37_vm1 = vcmask 7168   ;;  %s78_s0 = inlined_call_operand.vmem [shape: f32[8,128], index: 0, kind: input, shape index: {}]   ;;  %s79_s1 = inlined_call_operand.vmem [shape: f32[8,128], index: 1, kind: input, shape index: {}]   ;;  %s80_s2 = inlined_call_operand.vmem [shape: f32[8,1], index: 2, kind: input, shape index: {}]   ;;  %s81_s3 = inlined_call_operand.vmem [shape: f32[8,1], index: 3, kind: output, shape index: {}]  }
   0x1   :  { %v14_v0 = vld [vmem:[%s78_s0] sm:$0xff] }
   0x2   :  { %v15_v1 = vld [vmem:[%s79_s1] sm:$0xff]  ;;  %v22_v2 = vmul.f32 %v14_v0, %v14_v0 }
   0x3   :  { %v19_v3 = vmul.f32 %v15_v1, %v14_v0  ;;  %v26_v4 = vmul.f32 %v15_v1, %v15_v1  ;;  %v16_v10 = vld [vmem:[%s80_s2] sm:$0xff] }
   0x4   :  { %23 = vadd.xlane.f32.xlu0 %v22_v2  ;;  %v17_v11 = vmul.f32 2.0, %v16_v10 }
   0x5   :  { %20 = vadd.xlane.f32.xlu1 %v19_v3 }
   0x6   :  { %v43_v12 = vadd.f32 -1.0, %v17_v11 }
   0x8   :  { %27 = vadd.xlane.f32.xlu0 %v26_v4  ;;  %vm33_vm0 = vcmp.gt.f32.partialorder %v43_v12, 0.0 }
  0x91   :  { %v24_v5 = vpop.xlane.xlu0 %23 }
  0x92   :  { %v25_v7 = vadd.f32 1e-12, %v24_v5  ;;  %v21_v13 = vpop.xlane.xlu1 %20 }
  0x95   :  { %v28_v6 = vpop.xlane.xlu0 %27 }
  0x96   :  { %v29_v8 = vadd.f32 1e-12, %v28_v6 }
  0x98   :  { %v30_v9 = vmul.f32 %v29_v8, %v25_v7 }
  0x9a   :  { %44 = vrsqrt.f32 %v30_v9 }
  0xa4   :  { %v45_v14 = vpop.eup %44 }
  0xa5   :  { %v32_v15 = vmul.f32 %v45_v14, %v21_v13 }
  0xa7   :  { %v34_v16 = vsub.f32 1.0, %v32_v15  ;;  %v35_v17 = vmax.f32 %v32_v15, 0.0 }
  0xa9   :  { %v36_v18 = vsel %vm33_vm0, %v34_v16, %v35_v17 }
  0xaa   :  { %38 = vst.msk [vmem:[%s81_s3] sm:$0xff] %vm37_vm1, %v36_v18 }

</bundles_post_ra>
